<compile_context>
chip_gen: v7x
topology: tpu7x:2x2x1
jax: 0.10.0
libtpu: 0.0.40
codegen_flags: <defaults>
</compile_context>

<pallas_src>
import functools

import jax
import jax.numpy as jnp
import numpy as np
from jax.experimental import pallas as pl
from jax.experimental.pallas import tpu as pltpu


def _round_up(x, m):
    return (x + m - 1) // m * m


def _vmem_capacity_bytes():
    """Per-TensorCore VMEM capacity; conservative (v7x = 64 MiB) fallback."""
    try:
        info = pltpu.get_tpu_info()
        for attr in ("vmem_capacity_bytes", "vmem_bytes", "vmem_size_bytes"):
            v = getattr(info, attr, None)
            if v:
                return int(v)
    except Exception:
        pass
    return 64 * 1024 * 1024


def _plan_tiles(N, C, Cout, HW, dtype):
    """VMEM-aware choice of (batch block, spatial tile, grid extents, vmem_limit).

    Accounts for sublane padding of the channel dims and double-buffering of the
    x / out blocks.  v5e/v6e (128 MiB VMEM) naturally get ~2x the tile budget of
    v7x (64 MiB) because the budget is a fraction of queried capacity.
    """
    itemsize = jnp.dtype(dtype).itemsize
    sublanes = 8 * max(1, 4 // itemsize)          # sublane packing: 8 f32, 16 bf16
    c_pad = _round_up(C, sublanes)
    cout_pad = _round_up(Cout, sublanes)

    vmem = _vmem_capacity_bytes()
    block_budget = min(int(vmem * 0.45), 56 << 20)           # ~28 MiB v7x, ~56 MiB v5e/v6e
    weight_bytes = 2 * cout_pad * c_pad * itemsize            # tiny, resident across grid
    avail = max(block_budget - weight_bytes, 256 << 10)

    # Bytes per spatial lane (per batch row) across double-buffered x + out blocks.
    per_lane = 2 * (c_pad + cout_pad) * itemsize
    max_lanes = max(avail // per_lane, 128)

    if HW <= max_lanes:
        t_hw = HW                                  # full-extent spatial block (always legal)
    else:
        # Multiple-of-128 tile; ragged last tile handled by a cdiv grid (Pallas masks
        # out-of-range stores; the channel matmul never mixes spatial lanes).
        t_hw = max(128, (max_lanes // 128) * 128)
    n_hw_steps = pl.cdiv(HW, t_hw)

    # Batch blocking: amortize the ~600-cycle per-step overhead when one batch
    # element's slab is tiny, while keeping >= 2..4 grid steps for megacore
    # parallelism and DMA pipelining.
    b_blk = 1
    if n_hw_steps == 1 and N > 1:
        per_batch_bytes = per_lane * t_hw
        target_step_bytes = 4 << 20
        if per_batch_bytes < target_step_bytes:
            cap = min(
                avail // per_batch_bytes,
                max(target_step_bytes // per_batch_bytes, 1),
                max(N // 4, 1) if N >= 4 else 1,
            )
            for cand in range(int(cap), 0, -1):
                if N % cand == 0:
                    b_blk = cand
                    break
    n_b_steps = N // b_blk

    # Never leave the chip with a single grid step if the spatial axis can be split
    # (v7x has 2 TensorCores sharded over "parallel" axes, and 1 step kills pipelining).
    if n_b_steps * n_hw_steps < 2 and HW >= 256:
        t_hw = max(128, _round_up(pl.cdiv(HW, 2), 128))
        n_hw_steps = pl.cdiv(HW, t_hw)

    # Actual (double-buffered) block footprint drives the scoped VMEM limit.
    block_bytes = 2 * b_blk * (c_pad + cout_pad) * t_hw * itemsize + weight_bytes
    vmem_limit = int(block_bytes * 1.5) + (4 << 20)
    vmem_limit = max(16 << 20, min(vmem_limit, int(vmem * 0.94)))

    return b_blk, t_hw, n_b_steps, n_hw_steps, vmem_limit


def _tgrow_kernel(x_ref, w_ref, o_ref):
    # x_ref: (B_blk, C, T_hw)   channel-major pixels (lanes = spatial, lane-dense)
    # w_ref: (Cout, C)          1x1-conv weight
    # o_ref: (B_blk, Cout, T_hw)
    # Native-dtype operands straight into the MXU (bf16 stays bf16); f32 accumulate.
    w = w_ref[...]
    for b in range(x_ref.shape[0]):                 # short static unroll over batch block
        o_ref[b] = jnp.dot(
            w, x_ref[b], preferred_element_type=jnp.float32
        ).astype(o_ref.dtype)


@functools.partial(jax.jit, static_argnames=("stride",))
def tgrow_forward(x_nchw, weight, *, stride):
    """x_nchw: (N, C, H, W); weight: (C*stride, C, 1, 1) conv weight (PyTorch layout)."""
    N, C, H, W = x_nchw.shape
    Cout = weight.shape[0]
    assert Cout == C * stride

    HW = H * W
    x3d = x_nchw.reshape(N, C, HW)        # pure view (channel-major kept)
    w2d = weight.reshape(Cout, C)         # (Cout, Cin)

    b_blk, t_hw, n_b, n_hw, vmem_limit = _plan_tiles(N, C, Cout, HW, x_nchw.dtype)

    dsize = jnp.dtype(x_nchw.dtype).itemsize
    cost = pl.CostEstimate(
        flops=2 * N * HW * C * Cout,
        transcendentals=0,
        bytes_accessed=dsize * (N * C * HW + C * Cout + N * Cout * HW),
    )

    y3d = pl.pallas_call(
        _tgrow_kernel,
        out_shape=jax.ShapeDtypeStruct((N, Cout, HW), x_nchw.dtype),
        grid=(n_b, n_hw),
        in_specs=[
            # (B_blk, C, T_hw) slab: contiguous batch rows, lanes = spatial.
            pl.BlockSpec((b_blk, C, t_hw), lambda n, j: (n, 0, j)),
            # Full (tiny) weight, resident across the grid.
            pl.BlockSpec((Cout, C), lambda n, j: (0, 0)),
        ],
        out_specs=pl.BlockSpec((b_blk, Cout, t_hw), lambda n, j: (n, 0, j)),
        compiler_params=pltpu.CompilerParams(
            dimension_semantics=("parallel", "parallel"),
            vmem_limit_bytes=vmem_limit,
        ),
        cost_estimate=cost,
    )(x3d, w2d)

    # (N, Cout, HW) -> (N, Cout, H, W) -> (N*stride, C, H, W): contiguous views,
    # identical to PyTorch's reshape(-1, C, H, W) on the conv output.
    return y3d.reshape(N, Cout, H, W).reshape(N * stride, C, H, W)


def _reference(x_nchw, weight, stride):
    # Pure-JAX reference of the 1x1 conv + reshape (matches PyTorch semantics).
    N, C, H, W = x_nchw.shape
    w2d = weight.reshape(C * stride, C)  # (Cout, Cin)
    y = jnp.einsum("oc,nchw->nohw", w2d, x_nchw)  # (N, C*stride, H, W)
    return y.reshape(-1, C, H, W)


if __name__ == "__main__":
    key = jax.random.PRNGKey(0)
    k_x, k_w = jax.random.split(key)

    # Small shapes consistent with the module: batch=2, channels=4, spatial=16.
    N, C, H, W = 2, 4, 16, 16
    stride = 2

    x = jax.random.normal(k_x, (N, C, H, W), dtype=jnp.float32)
    # Deterministic conv weight init: (C*stride, C, 1, 1), kaiming-uniform-ish bound.
    bound = 1.0 / np.sqrt(C)
    weight = jax.random.uniform(
        k_w, (C * stride, C, 1, 1), dtype=jnp.float32, minval=-bound, maxval=bound
    )

    out = tgrow_forward(x, weight, stride=stride)
    out = jax.block_until_ready(out)

    ref = _reference(x, weight, stride)
    assert out.shape == (N * stride, C, H, W), out.shape
    np.testing.assert_allclose(np.asarray(out), np.asarray(ref), rtol=1e-5, atol=1e-5)

    print("KERNEL_OK")
</pallas_src>

<mosaic_0001>
module attributes {stable_mosaic.version = 11 : i64} {
  func.func @_tgrow_kernel(%arg0: i32, %arg1: i32, %arg2: memref<1x4x256xf32, #tpu.memory_space<vmem>>, %arg3: memref<8x4xf32, #tpu.memory_space<vmem>>, %arg4: memref<1x8x256xf32, #tpu.memory_space<vmem>>) attributes {dimension_semantics = [#tpu.dimension_semantics<parallel>, #tpu.dimension_semantics<parallel>], iteration_bounds = array<i64: 2, 1>, scalar_prefetch = 0 : i64, scratch_operands = 0 : i64, tpu.core_type = #tpu.core_type<tc>, window_params = [{transform_indices = @transform_0, window_bounds = array<i64: 1, 4, 256>}, {pipeline_mode = #tpu.pipeline_mode<synchronous>, transform_indices = @transform_1, window_bounds = array<i64: 8, 4>}, {transform_indices = @transform_2, window_bounds = array<i64: 1, 8, 256>}]} {
    %c0 = arith.constant 0 : index
    %c0_0 = arith.constant 0 : index
    %0 = vector.load %arg3[%c0, %c0_0] : memref<8x4xf32, #tpu.memory_space<vmem>>, vector<8x4xf32>
    %c0_1 = arith.constant 0 : index
    %c0_2 = arith.constant 0 : index
    %c0_3 = arith.constant 0 : index
    %1 = vector.load %arg2[%c0_1, %c0_2, %c0_3] : memref<1x4x256xf32, #tpu.memory_space<vmem>>, vector<1x4x256xf32>
    %2 = vector.shape_cast %1 : vector<1x4x256xf32> to vector<4x256xf32>
    %cst = arith.constant dense<0.000000e+00> : vector<8x256xf32>
    %3 = tpu.matmul %0, %2, %cst {dimension_numbers = #tpu.dot_dimension_numbers<[1], [0], [0], [1], [0, 0, 1, 1], [], []>} : vector<8x4xf32>, vector<4x256xf32>, vector<8x256xf32> -> vector<8x256xf32>
    %c0_4 = arith.constant 0 : index
    %c0_5 = arith.constant 0 : index
    %c0_6 = arith.constant 0 : index
    %4 = vector.load %arg4[%c0_4, %c0_5, %c0_6] : memref<1x8x256xf32, #tpu.memory_space<vmem>>, vector<1x8x256xf32>
    %5 = vector.shape_cast %4 : vector<1x8x256xf32> to vector<8x256xf32>
    %6 = vector.shape_cast %3 : vector<8x256xf32> to vector<1x8x256xf32>
    tpu.vector_store %arg4[%c0_4, %c0_5, %c0_6], %6 {strides = array<i32>} : memref<1x8x256xf32, #tpu.memory_space<vmem>>, vector<1x8x256xf32>,
    return
  }
  func.func @transform_0(%arg0: i32, %arg1: i32) -> (i32, i32, i32) {
    %c0_i32 = arith.constant 0 : i32
    %c0_i32_0 = arith.constant 0 : i32
    return %arg0, %c0_i32, %arg1 : i32, i32, i32
  }
  func.func @transform_1(%arg0: i32, %arg1: i32) -> (i32, i32) {
    %c0_i32 = arith.constant 0 : i32
    %c0_i32_0 = arith.constant 0 : i32
    %c0_i32_1 = arith.constant 0 : i32
    return %c0_i32, %c0_i32_0 : i32, i32
  }
  func.func @transform_2(%arg0: i32, %arg1: i32) -> (i32, i32, i32) {
    %c0_i32 = arith.constant 0 : i32
    %c0_i32_0 = arith.constant 0 : i32
    return %arg0, %c0_i32, %arg1 : i32, i32, i32
  }
}

</mosaic_0001>

<bundles_post_ra>
// kernel: tgrow_forward.1
= control target key start
LH: loop header
LB: loop body
LE: loop exit
PB: predicated region body
PF: predicated region fallthrough
CT: control target
= control target key end

     0   :  { %s438_s9 = smov 0   ;;  %s440_s10 = smov 0   ;;  %s471_s0 = inlined_call_operand.vmem [shape: f32[2,4,256], index: 0, kind: input, shape index: {}]   ;;  %s472_s1 = inlined_call_operand.vmem [shape: f32[8,4], index: 1, kind: input, shape index: {}]   ;;  %s473_s2 = inlined_call_operand.vmem [shape: f32[2,8,256], index: 2, kind: output, shape index: {}]  }
   0x1   :  { %s442_s11 = smov 0  }
   0x2 LB: > { %s24_s12 = sadd.s32 1, %s416_s10  ;;  %p360_p0 = scmp.ge.s32.totalorder %s420_s11, 1  ;;  %s420_s11 = sphi %s442_s11, %s12_s11   ;;  %s416_s10 = sphi %s440_s10, %s475_s10   ;;  %s412_s9 = sphi %s438_s9, %s474_s9  }
   0x3   : > { %p26_p1 = scmp.ge.s32.totalorder %s24_s12, 2  ;;  %p133_p2 = scmp.lt.s32.totalorder %s420_s11, 3 }
   0x5   : > { %s477_s12 = smov (%p26_p1, %s24_s12), 0  ;;  %p134_p3 = pnand %p360_p0, %p133_p2 }
   0x6   : > { %p164_p4 = scmp.lt.s32.totalorder (!%p134_p3), %s412_s9, 1  ;;  %v422_v0 = vmov (!%p134_p3), 0.0   ;;  %vm191_vm0 = vcmask (!%p134_p3), 1043456   ;;  %v183_v3 = vld [vmem:[%s472_s1] sm:$0xff] (!%p134_p3)  ;;  %vm187_vm1 = vcmask (!%p134_p3), 31744  }
   0x7   : > { %137 = sbr.rel (%p134_p3) target bundleno = 236 (0xec), region = 28  ;;  %260 = vmatprep.mubr.f32.mxu0 (!%p134_p3), %v422_v0 }
   0xe   : > { %s479_s9 = smov (!%p164_p4, %s412_s9), 1 }
   0xf   : > { %s370_s13 = sshll.u32 %s479_s9, 3  ;;  %s371_s19 = sshll.u32 %s479_s9, 4 }
  0x10   : > { %s171_s16 = scalar_lea.vmem %s471_s0, %s370_s13  ;;  %s181_s22 = scalar_lea.vmem %s473_s2, %s371_s19 }
  0x11   : > { %v184_v1 = vld [vmem:[%s171_s16] sm:$0xff] }
  0x12   : > { %v186_v2 = vcombine.high %v184_v1, %v184_v1 }
  0x14   : > { %365 = vmatprep.subr.msk.mxu0 %vm191_vm0, %v186_v2 }
  0x15   : > { %366 = vmatpush1.msk.msra.mxu0 %vm191_vm0, %v184_v1 }
  0x16   : > { %367 = vmatmul.mubr.msk.f32.vlgmr.msra.gmra.mrb[0].mxu0 %vm187_vm1, %v183_v3 }
  0xe9   : > { %v262_v4 = vpop.f32.mrb[0].mxu0 }
  0xea   : > { %267 = vst [vmem:[%s181_s22] sm:$0xff] %v262_v4  ;;  %v264_v5 = vpop.f32.mrb[1].mxu0 }
  0xeb   : > { %268 = vst [vmem:[%s181_s22 + $0x8] sm:$0xff] %v264_v5 }
  0xec PF: > { %s12_s11 = sadd.s32 1, %s420_s11   ;;  %s474_s9 = smov %s416_s10 }
  0xed   : > { %p9_p5 = scmp.ge.s32.totalorder %s12_s11, 4   ;;  %s475_s10 = smov %s477_s12 }
  0xef   :  { %11 = sbr.rel (!%p9_p5) target bundleno = 2 (0x2), region = 58 }

</bundles_post_ra>
